<compile_context>
chip_gen: v5e
topology: v5e:2x2
jax: 0.10.0
libtpu: 0.0.40
codegen_flags: <defaults>
</compile_context>

<pallas_src>
import jax
import jax.numpy as jnp
from jax.experimental import pallas as pl
from jax.experimental.pallas import tpu as pltpu


def make_mlp_eval_kernel(num_inputs, num_outputs, hidden_size, matmul_dtype):
    NI, NO, H = num_inputs, num_outputs, hidden_size

    def kernel(x_ref, w1_ref, b1_ref, w2_ref, b2_ref, o_ref):
        # x_ref: (NI, TB) -- batch on the lane axis. Cast in-register (no extra
        # HBM pass) so the bf16 path does not need a separate XLA cast of x.
        x = x_ref[...].astype(matmul_dtype)              # (NI, TB)
        w1 = w1_ref[...]                                 # (H, NI)
        w2 = w2_ref[...]                                 # (NI*NO, H)

        # fc[0]: Linear(NI, H) + fc[1]: ReLU      (MXU, f32 accumulate)
        # h^T = W1 @ x^T + b1
        h = jnp.dot(w1, x, preferred_element_type=jnp.float32) + b1_ref[...]
        h = jnp.maximum(h, 0.0)                          # (H, TB) f32

        # fc[2]: Linear(H, NO*NI)                 (MXU, f32 accumulate)
        # logits^T = W2 @ h^T + b2
        logits = jnp.dot(w2, h.astype(matmul_dtype),
                         preferred_element_type=jnp.float32) + b2_ref[...]  # (NI*NO, TB)

        # Softmax over each contiguous group of NO rows == softmax(dim=-1) after
        # view(-1, NI, NO). The group axis is the SUBLANE axis, so every op below
        # spans the full 128-lane batch tile (full VPU/EUP occupancy); NI is small
        # and static so this loop fully unrolls.
        groups = []
        for i in range(NI):
            g = logits[i * NO:(i + 1) * NO, :]           # (NO, TB) value slice
            m = jnp.max(g, axis=0, keepdims=True)        # (1, TB) sublane reduce
            e = jnp.exp(g - m)
            s = jnp.sum(e, axis=0, keepdims=True)        # (1, TB)
            groups.append(e / s)                         # exact normalization
        # Single lane-dense (NI*NO, TB) store.
        o_ref[...] = jnp.concatenate(groups, axis=0)

    return kernel


def _pick_block_b(batch):
    # Big lane-dense tiles (small tiles are per-step-overhead dominated), but
    # keep >= 2 grid steps when the batch allows so both v7x TensorCores get
    # work under dimension_semantics=("parallel",).
    tb = min(2048, pl.next_power_of_2(max(batch, 128)))
    while tb > 128 and batch <= tb:
        tb //= 2
    return max(tb, 128)


def mlp_eval_forward(x, w1, b1, w2, b2, *, num_inputs, num_outputs, hidden_size,
                     block_b=None, matmul_dtype=jnp.float32):
    """Fused MLP_eval forward pass.

    x  : (B, NI) activations (any float dtype; cast to matmul_dtype in-kernel).
    w1 : (H, NI), b1: (H,), w2: (NI*NO, H), b2: (NI*NO,)  -- torch Linear layout.
    matmul_dtype: jnp.bfloat16 recommended on v6e/v7x (f32 accumulate + f32
                  softmax either way); default f32 keeps reference numerics.
    Returns probs of shape (B, NI, NO).
    """
    B = x.shape[0]
    NI, NO, H = num_inputs, num_outputs, hidden_size

    if block_b is None:
        TB = _pick_block_b(B)
    else:
        TB = max(128, ((block_b + 127) // 128) * 128)    # lane-dense tiles only
    Bp = pl.cdiv(B, TB) * TB
    grid = (Bp // TB,)

    # Layout plumbing: batch goes on the lane axis; zero-pad ragged batches
    # (padded columns produce finite softmax values and are sliced off below).
    x_t = x.T                                            # (NI, B)
    if Bp != B:
        x_t = jnp.pad(x_t, ((0, 0), (0, Bp - B)))
    w1m = w1.astype(matmul_dtype)                        # tiny, resident
    w2m = w2.astype(matmul_dtype)                        # tiny, resident
    b1c = b1.reshape(H, 1).astype(jnp.float32)
    b2c = b2.reshape(NI * NO, 1).astype(jnp.float32)

    itemsize = jnp.dtype(matmul_dtype).itemsize
    cost = pl.CostEstimate(
        flops=2 * Bp * (NI * H + H * NI * NO),
        transcendentals=Bp * NI * NO,
        bytes_accessed=(x_t.size * x_t.dtype.itemsize          # activation stream
                        + Bp * NI * NO * 4                      # probs out
                        + (w1m.size + w2m.size) * itemsize
                        + (b1c.size + b2c.size) * 4))

    out_t = pl.pallas_call(
        make_mlp_eval_kernel(NI, NO, H, matmul_dtype),
        out_shape=jax.ShapeDtypeStruct((NI * NO, Bp), jnp.float32),
        grid=grid,
        in_specs=[
            pl.BlockSpec((NI, TB), lambda i: (0, i)),           # x^T, tiled on lanes
            pl.BlockSpec((H, NI), lambda i: (0, 0)),            # W1 resident
            pl.BlockSpec((H, 1), lambda i: (0, 0)),             # b1 resident
            pl.BlockSpec((NI * NO, H), lambda i: (0, 0)),       # W2 resident
            pl.BlockSpec((NI * NO, 1), lambda i: (0, 0)),       # b2 resident
        ],
        out_specs=pl.BlockSpec((NI * NO, TB), lambda i: (0, i)),
        compiler_params=pltpu.CompilerParams(
            dimension_semantics=("parallel",)),  # batch tiles are independent
        cost_estimate=cost,
    )(x_t, w1m, b1c, w2m, b2c)

    # glue: undo the lane-major layout and apply .view(-1, NI, NO)
    return out_t[:, :B].T.reshape(B, NI, NO)


def reference_forward(x, w1, b1, w2, b2, *, num_inputs, num_outputs):
    # Same math/layout as torch: y = x @ W.T + b
    h = jnp.maximum(x @ w1.T + b1, 0.0)
    logits = (h @ w2.T + b2).reshape(-1, num_inputs, num_outputs)
    return jax.nn.softmax(logits, axis=-1)


if __name__ == "__main__":
    # Small shapes consistent with the module's forward. B=200 is not a tile
    # multiple on purpose (exercises the zero-padding path) and still gives a
    # 2-step "parallel" grid with the default 128-row tiles.
    B, NI, NO, H = 200, 8, 4, 32  # batch, num_inputs, num_outputs, hidden_size

    key = jax.random.PRNGKey(0)
    kx, kw1, kb1, kw2, kb2 = jax.random.split(key, 5)

    x = jax.random.normal(kx, (B, NI), dtype=jnp.float32)
    # Deterministic synthetic parameter init in torch Linear layout.
    w1 = jax.random.normal(kw1, (H, NI), dtype=jnp.float32) * 0.1
    b1 = jax.random.normal(kb1, (H,), dtype=jnp.float32) * 0.1
    w2 = jax.random.normal(kw2, (NI * NO, H), dtype=jnp.float32) * 0.1
    b2 = jax.random.normal(kb2, (NI * NO,), dtype=jnp.float32) * 0.1

    ref = reference_forward(x, w1, b1, w2, b2, num_inputs=NI, num_outputs=NO)

    # f32 path (bit-comparable numerics).
    probs = mlp_eval_forward(
        x, w1, b1, w2, b2,
        num_inputs=NI, num_outputs=NO, hidden_size=H,
        matmul_dtype=jnp.float32)
    probs = jax.block_until_ready(probs)
    assert probs.shape == (B, NI, NO)
    # Exact normalization -> rows sum to 1 to f32 precision.
    assert jnp.allclose(jnp.sum(probs, axis=-1), 1.0, atol=1e-5)
    assert jnp.allclose(probs, ref, atol=1e-4, rtol=1e-3)

    # bf16 matmul path (recommended default on v6e/v7x): f32 accumulate + f32
    # softmax; hidden activations are down-cast to bf16 before the second matmul.
    probs_bf16 = mlp_eval_forward(
        x, w1, b1, w2, b2,
        num_inputs=NI, num_outputs=NO, hidden_size=H,
        matmul_dtype=jnp.bfloat16)
    probs_bf16 = jax.block_until_ready(probs_bf16)
    assert probs_bf16.shape == (B, NI, NO)
    assert jnp.allclose(jnp.sum(probs_bf16, axis=-1), 1.0, atol=1e-5)
    assert jnp.allclose(probs_bf16, ref, atol=1e-2, rtol=1e-2)

    print("KERNEL_OK")
</pallas_src>

<mosaic_0001>
module attributes {stable_mosaic.version = 11 : i64} {
  func.func @kernel(%arg0: i32, %arg1: memref<8x128xf32, #tpu.memory_space<vmem>>, %arg2: memref<32x8xf32, #tpu.memory_space<vmem>>, %arg3: memref<32x1xf32, #tpu.memory_space<vmem>>, %arg4: memref<32x32xf32, #tpu.memory_space<vmem>>, %arg5: memref<32x1xf32, #tpu.memory_space<vmem>>, %arg6: memref<32x128xf32, #tpu.memory_space<vmem>>) attributes {dimension_semantics = [#tpu.dimension_semantics<parallel>], iteration_bounds = array<i64: 2>, scalar_prefetch = 0 : i64, scratch_operands = 0 : i64, tpu.core_type = #tpu.core_type<tc>, window_params = [{transform_indices = @transform_0, window_bounds = array<i64: 8, 128>}, {pipeline_mode = #tpu.pipeline_mode<synchronous>, transform_indices = @transform_1, window_bounds = array<i64: 32, 8>}, {pipeline_mode = #tpu.pipeline_mode<synchronous>, transform_indices = @transform_2, window_bounds = array<i64: 32, 1>}, {pipeline_mode = #tpu.pipeline_mode<synchronous>, transform_indices = @transform_3, window_bounds = array<i64: 32, 32>}, {pipeline_mode = #tpu.pipeline_mode<synchronous>, transform_indices = @transform_4, window_bounds = array<i64: 32, 1>}, {transform_indices = @transform_5, window_bounds = array<i64: 32, 128>}]} {
    %c0 = arith.constant 0 : index
    %c0_0 = arith.constant 0 : index
    %0 = vector.load %arg1[%c0, %c0_0] : memref<8x128xf32, #tpu.memory_space<vmem>>, vector<8x128xf32>
    %c0_1 = arith.constant 0 : index
    %c0_2 = arith.constant 0 : index
    %1 = vector.load %arg2[%c0_1, %c0_2] : memref<32x8xf32, #tpu.memory_space<vmem>>, vector<32x8xf32>
    %c0_3 = arith.constant 0 : index
    %c0_4 = arith.constant 0 : index
    %2 = vector.load %arg4[%c0_3, %c0_4] : memref<32x32xf32, #tpu.memory_space<vmem>>, vector<32x32xf32>
    %cst = arith.constant dense<0.000000e+00> : vector<32x128xf32>
    %3 = tpu.matmul %1, %0, %cst {dimension_numbers = #tpu.dot_dimension_numbers<[1], [0], [0], [1], [0, 0, 1, 1], [], []>} : vector<32x8xf32>, vector<8x128xf32>, vector<32x128xf32> -> vector<32x128xf32>
    %c0_5 = arith.constant 0 : index
    %c0_6 = arith.constant 0 : index
    %4 = vector.load %arg3[%c0_5, %c0_6] : memref<32x1xf32, #tpu.memory_space<vmem>>, vector<32x1xf32>
    %5 = vector.broadcast %4 : vector<32x1xf32> to vector<32x128xf32>
    %6 = arith.addf %3, %5 : vector<32x128xf32>
    %cst_7 = arith.constant 0.000000e+00 : f32
    %7 = vector.broadcast %cst_7 : f32 to vector<32x128xf32>
    %8 = arith.maximumf %6, %7 : vector<32x128xf32>
    %cst_8 = arith.constant dense<0.000000e+00> : vector<32x128xf32>
    %9 = tpu.matmul %2, %8, %cst_8 {dimension_numbers = #tpu.dot_dimension_numbers<[1], [0], [0], [1], [0, 0, 1, 1], [], []>} : vector<32x32xf32>, vector<32x128xf32>, vector<32x128xf32> -> vector<32x128xf32>
    %c0_9 = arith.constant 0 : index
    %c0_10 = arith.constant 0 : index
    %10 = vector.load %arg5[%c0_9, %c0_10] : memref<32x1xf32, #tpu.memory_space<vmem>>, vector<32x1xf32>
    %11 = vector.broadcast %10 : vector<32x1xf32> to vector<32x128xf32>
    %12 = arith.addf %9, %11 : vector<32x128xf32>
    %13 = vector.extract_strided_slice %12 {offsets = [0, 0], sizes = [4, 128], strides = [1, 1]} : vector<32x128xf32> to vector<4x128xf32>
    %cst_11 = arith.constant dense<0xFF800000> : vector<128xf32>
    %14 = vector.multi_reduction <maximumf>, %13, %cst_11 [0] : vector<4x128xf32> to vector<128xf32>
    %15 = vector.shape_cast %14 : vector<128xf32> to vector<1x128xf32>
    %16 = vector.broadcast %15 : vector<1x128xf32> to vector<4x128xf32>
    %17 = arith.subf %13, %16 : vector<4x128xf32>
    %18 = math.exp %17 : vector<4x128xf32>
    %cst_12 = arith.constant dense<0.000000e+00> : vector<128xf32>
    %19 = vector.multi_reduction <add>, %18, %cst_12 [0] : vector<4x128xf32> to vector<128xf32>
    %20 = vector.shape_cast %19 : vector<128xf32> to vector<1x128xf32>
    %21 = vector.broadcast %20 : vector<1x128xf32> to vector<4x128xf32>
    %22 = arith.divf %18, %21 : vector<4x128xf32>
    %23 = vector.extract_strided_slice %12 {offsets = [4, 0], sizes = [4, 128], strides = [1, 1]} : vector<32x128xf32> to vector<4x128xf32>
    %cst_13 = arith.constant dense<0xFF800000> : vector<128xf32>
    %24 = vector.multi_reduction <maximumf>, %23, %cst_13 [0] : vector<4x128xf32> to vector<128xf32>
    %25 = vector.shape_cast %24 : vector<128xf32> to vector<1x128xf32>
    %26 = vector.broadcast %25 : vector<1x128xf32> to vector<4x128xf32>
    %27 = arith.subf %23, %26 : vector<4x128xf32>
    %28 = math.exp %27 : vector<4x128xf32>
    %cst_14 = arith.constant dense<0.000000e+00> : vector<128xf32>
    %29 = vector.multi_reduction <add>, %28, %cst_14 [0] : vector<4x128xf32> to vector<128xf32>
    %30 = vector.shape_cast %29 : vector<128xf32> to vector<1x128xf32>
    %31 = vector.broadcast %30 : vector<1x128xf32> to vector<4x128xf32>
    %32 = arith.divf %28, %31 : vector<4x128xf32>
    %33 = vector.extract_strided_slice %12 {offsets = [8, 0], sizes = [4, 128], strides = [1, 1]} : vector<32x128xf32> to vector<4x128xf32>
    %cst_15 = arith.constant dense<0xFF800000> : vector<128xf32>
    %34 = vector.multi_reduction <maximumf>, %33, %cst_15 [0] : vector<4x128xf32> to vector<128xf32>
    %35 = vector.shape_cast %34 : vector<128xf32> to vector<1x128xf32>
    %36 = vector.broadcast %35 : vector<1x128xf32> to vector<4x128xf32>
    %37 = arith.subf %33, %36 : vector<4x128xf32>
    %38 = math.exp %37 : vector<4x128xf32>
    %cst_16 = arith.constant dense<0.000000e+00> : vector<128xf32>
    %39 = vector.multi_reduction <add>, %38, %cst_16 [0] : vector<4x128xf32> to vector<128xf32>
    %40 = vector.shape_cast %39 : vector<128xf32> to vector<1x128xf32>
    %41 = vector.broadcast %40 : vector<1x128xf32> to vector<4x128xf32>
    %42 = arith.divf %38, %41 : vector<4x128xf32>
    %43 = vector.extract_strided_slice %12 {offsets = [12, 0], sizes = [4, 128], strides = [1, 1]} : vector<32x128xf32> to vector<4x128xf32>
    %cst_17 = arith.constant dense<0xFF800000> : vector<128xf32>
    %44 = vector.multi_reduction <maximumf>, %43, %cst_17 [0] : vector<4x128xf32> to vector<128xf32>
    %45 = vector.shape_cast %44 : vector<128xf32> to vector<1x128xf32>
    %46 = vector.broadcast %45 : vector<1x128xf32> to vector<4x128xf32>
    %47 = arith.subf %43, %46 : vector<4x128xf32>
    %48 = math.exp %47 : vector<4x128xf32>
    %cst_18 = arith.constant dense<0.000000e+00> : vector<128xf32>
    %49 = vector.multi_reduction <add>, %48, %cst_18 [0] : vector<4x128xf32> to vector<128xf32>
    %50 = vector.shape_cast %49 : vector<128xf32> to vector<1x128xf32>
    %51 = vector.broadcast %50 : vector<1x128xf32> to vector<4x128xf32>
    %52 = arith.divf %48, %51 : vector<4x128xf32>
    %53 = vector.extract_strided_slice %12 {offsets = [16, 0], sizes = [4, 128], strides = [1, 1]} : vector<32x128xf32> to vector<4x128xf32>
    %cst_19 = arith.constant dense<0xFF800000> : vector<128xf32>
    %54 = vector.multi_reduction <maximumf>, %53, %cst_19 [0] : vector<4x128xf32> to vector<128xf32>
    %55 = vector.shape_cast %54 : vector<128xf32> to vector<1x128xf32>
    %56 = vector.broadcast %55 : vector<1x128xf32> to vector<4x128xf32>
    %57 = arith.subf %53, %56 : vector<4x128xf32>
    %58 = math.exp %57 : vector<4x128xf32>
    %cst_20 = arith.constant dense<0.000000e+00> : vector<128xf32>
    %59 = vector.multi_reduction <add>, %58, %cst_20 [0] : vector<4x128xf32> to vector<128xf32>
    %60 = vector.shape_cast %59 : vector<128xf32> to vector<1x128xf32>
    %61 = vector.broadcast %60 : vector<1x128xf32> to vector<4x128xf32>
    %62 = arith.divf %58, %61 : vector<4x128xf32>
    %63 = vector.extract_strided_slice %12 {offsets = [20, 0], sizes = [4, 128], strides = [1, 1]} : vector<32x128xf32> to vector<4x128xf32>
    %cst_21 = arith.constant dense<0xFF800000> : vector<128xf32>
    %64 = vector.multi_reduction <maximumf>, %63, %cst_21 [0] : vector<4x128xf32> to vector<128xf32>
    %65 = vector.shape_cast %64 : vector<128xf32> to vector<1x128xf32>
    %66 = vector.broadcast %65 : vector<1x128xf32> to vector<4x128xf32>
    %67 = arith.subf %63, %66 : vector<4x128xf32>
    %68 = math.exp %67 : vector<4x128xf32>
    %cst_22 = arith.constant dense<0.000000e+00> : vector<128xf32>
    %69 = vector.multi_reduction <add>, %68, %cst_22 [0] : vector<4x128xf32> to vector<128xf32>
    %70 = vector.shape_cast %69 : vector<128xf32> to vector<1x128xf32>
    %71 = vector.broadcast %70 : vector<1x128xf32> to vector<4x128xf32>
    %72 = arith.divf %68, %71 : vector<4x128xf32>
    %73 = vector.extract_strided_slice %12 {offsets = [24, 0], sizes = [4, 128], strides = [1, 1]} : vector<32x128xf32> to vector<4x128xf32>
    %cst_23 = arith.constant dense<0xFF800000> : vector<128xf32>
    %74 = vector.multi_reduction <maximumf>, %73, %cst_23 [0] : vector<4x128xf32> to vector<128xf32>
    %75 = vector.shape_cast %74 : vector<128xf32> to vector<1x128xf32>
    %76 = vector.broadcast %75 : vector<1x128xf32> to vector<4x128xf32>
    %77 = arith.subf %73, %76 : vector<4x128xf32>
    %78 = math.exp %77 : vector<4x128xf32>
    %cst_24 = arith.constant dense<0.000000e+00> : vector<128xf32>
    %79 = vector.multi_reduction <add>, %78, %cst_24 [0] : vector<4x128xf32> to vector<128xf32>
    %80 = vector.shape_cast %79 : vector<128xf32> to vector<1x128xf32>
    %81 = vector.broadcast %80 : vector<1x128xf32> to vector<4x128xf32>
    %82 = arith.divf %78, %81 : vector<4x128xf32>
    %83 = vector.extract_strided_slice %12 {offsets = [28, 0], sizes = [4, 128], strides = [1, 1]} : vector<32x128xf32> to vector<4x128xf32>
    %cst_25 = arith.constant dense<0xFF800000> : vector<128xf32>
    %84 = vector.multi_reduction <maximumf>, %83, %cst_25 [0] : vector<4x128xf32> to vector<128xf32>
    %85 = vector.shape_cast %84 : vector<128xf32> to vector<1x128xf32>
    %86 = vector.broadcast %85 : vector<1x128xf32> to vector<4x128xf32>
    %87 = arith.subf %83, %86 : vector<4x128xf32>
    %88 = math.exp %87 : vector<4x128xf32>
    %cst_26 = arith.constant dense<0.000000e+00> : vector<128xf32>
    %89 = vector.multi_reduction <add>, %88, %cst_26 [0] : vector<4x128xf32> to vector<128xf32>
    %90 = vector.shape_cast %89 : vector<128xf32> to vector<1x128xf32>
    %91 = vector.broadcast %90 : vector<1x128xf32> to vector<4x128xf32>
    %92 = arith.divf %88, %91 : vector<4x128xf32>
    %93 = tpu.concatenate %22, %32, %42, %52, %62, %72, %82, %92 in 0 : vector<4x128xf32>, vector<4x128xf32>, vector<4x128xf32>, vector<4x128xf32>, vector<4x128xf32>, vector<4x128xf32>, vector<4x128xf32>, vector<4x128xf32> -> vector<32x128xf32>
    %c0_27 = arith.constant 0 : index
    %c0_28 = arith.constant 0 : index
    %94 = vector.load %arg6[%c0_27, %c0_28] : memref<32x128xf32, #tpu.memory_space<vmem>>, vector<32x128xf32>
    tpu.vector_store %arg6[%c0_27, %c0_28], %93 {strides = array<i32>} : memref<32x128xf32, #tpu.memory_space<vmem>>, vector<32x128xf32>,
    return
  }
  func.func @transform_0(%arg0: i32) -> (i32, i32) {
    %c0_i32 = arith.constant 0 : i32
    %c0_i32_0 = arith.constant 0 : i32
    return %c0_i32, %arg0 : i32, i32
  }
  func.func @transform_1(%arg0: i32) -> (i32, i32) {
    %c0_i32 = arith.constant 0 : i32
    %c0_i32_0 = arith.constant 0 : i32
    %c0_i32_1 = arith.constant 0 : i32
    return %c0_i32, %c0_i32_0 : i32, i32
  }
  func.func @transform_2(%arg0: i32) -> (i32, i32) {
    %c0_i32 = arith.constant 0 : i32
    %c0_i32_0 = arith.constant 0 : i32
    %c0_i32_1 = arith.constant 0 : i32
    return %c0_i32, %c0_i32_0 : i32, i32
  }
  func.func @transform_3(%arg0: i32) -> (i32, i32) {
    %c0_i32 = arith.constant 0 : i32
    %c0_i32_0 = arith.constant 0 : i32
    %c0_i32_1 = arith.constant 0 : i32
    return %c0_i32, %c0_i32_0 : i32, i32
  }
  func.func @transform_4(%arg0: i32) -> (i32, i32) {
    %c0_i32 = arith.constant 0 : i32
    %c0_i32_0 = arith.constant 0 : i32
    %c0_i32_1 = arith.constant 0 : i32
    return %c0_i32, %c0_i32_0 : i32, i32
  }
  func.func @transform_5(%arg0: i32) -> (i32, i32) {
    %c0_i32 = arith.constant 0 : i32
    %c0_i32_0 = arith.constant 0 : i32
    return %c0_i32, %arg0 : i32, i32
  }
}

</mosaic_0001>

<bundles_post_ra>
// kernel: tpu_custom_call.1
= control target key start
LH: loop header
LB: loop body
LE: loop exit
PB: predicated region body
PF: predicated region fallthrough
CT: control target
= control target key end

     0   :  { %10 = vsyncpa [#allocation3], 0  ;;  %s1208_s0 = inlined_call_operand.vmem [shape: f32[8,256], index: 0, kind: input, shape index: {}]   ;;  %s1209_s1 = inlined_call_operand.vmem [shape: f32[32,8], index: 1, kind: input, shape index: {}]   ;;  %s1210_s2 = inlined_call_operand.vmem [shape: f32[32,1], index: 2, kind: input, shape index: {}]   ;;  %s1211_s3 = inlined_call_operand.vmem [shape: f32[32,32], index: 3, kind: input, shape index: {}]   ;;  %s1212_s4 = inlined_call_operand.vmem [shape: f32[32,1], index: 4, kind: input, shape index: {}]   ;;  %s1213_s5 = inlined_call_operand.hbm [shape: f32[32,256], index: 5, kind: output, shape index: {}]  }
   0x1   :  { %12 = vsyncpa [#allocation3 + $0x1], 0  ;;  %s919_s18 = smov 0   ;;  %s921_s19 = smov 0  }
   0x2   :  { %s923_s20 = smov 0   ;;  %s925_s21 = smov 0  }
   0x3 LB: > { %s940_s22 = sadd.s32 4294967295, %s883_s21   ;;  %s720_s23 = sadd.s32 4294967294, %s883_s21   ;;  %s883_s21 = sphi %s925_s21, %s1229_s21   ;;  %s879_s20 = sphi %s923_s20, %s1228_s20   ;;  %s875_s19 = sphi %s921_s19, %s1227_s19   ;;  %s871_s18 = sphi %s919_s18, %s1226_s18  }
   0x4   : > { %s944_s24 = sadd.s32 1, %s883_s21   ;;  %s135_s25 = sadd.s32 1, %s879_s20 }
   0x5   : > { %s132_s26 = ssub.s32 %s883_s21, %s944_s24  ;;  %p145_p0 = scmp.ne.s32.totalorder %s879_s20, %s875_s19 }
   0x6   : > { %p133_p1 = scmp.eq.s32.totalorder %s132_s26, 0  ;;  %p146_p2 = scmp.eq.s32.totalorder %s940_s22, 1 }
   0x7   : > { %p151_p3 = scmp.ne.s32.totalorder %s875_s19, %s871_s18  ;;  %p152_p4 = scmp.eq.s32.totalorder %s720_s23, 1 }
   0x8   : > { %s955_s27 = scalar_select %p133_p1, %s879_s20, %s135_s25  }
   0x9   : > { %p957_p5 = por %p146_p2, %p145_p0  ;;  %p961_p6 = por %p152_p4, %p151_p3 }
   0xa   : > { %p723_p7 = scmp.ge.s32.totalorder %s883_s21, 1  ;;  %p189_p8 = scmp.lt.s32.totalorder %s883_s21, 3 }
   0xc   : > { %p190_p9 = pnand %p723_p7, %p189_p8 }
   0xd   : > { %p216_p10 = scmp.lt.s32.totalorder (!%p190_p9), %s940_s22, 1  ;;  %s841_s7 = scalar_lea.hbm (!%p190_p9), %s1213_s5, 64 }
   0xe   : > { %193 = sbr.rel (%p190_p9) target bundleno = 408 (0x198), region = 40 }
  0x13   : > { %v232_v0 = vld [vmem:[%s1210_s2 + $0x18] sm:$0xff]  ;;  %v885_v1 = vmov 0   ;;  %v230_v2 = vld [vmem:[%s1210_s2 + $0x8] sm:$0xff]  ;;  %s217_s9 = scalar_select %p216_p10, %s940_s22, 1  ;;  %vm253_vm0 = vcmask 64512   ;;  %v221_v4 = vld [vmem:[%s1209_s1] sm:$0xff] }
  0x14   : > { %786 = vset.pattern.permute.xlu0 %v885_v1  ;;  %787 = vset.pattern.permute.xlu1 %v885_v1  ;;  %v222_v3 = vld [vmem:[%s1209_s1 + $0x8] sm:$0xff]  ;;  %v231_v6 = vld [vmem:[%s1210_s2 + $0x10] sm:$0xff]  ;;  %v229_v7 = vld [vmem:[%s1210_s2] sm:$0xff]  ;;  %vm323_vm1 = vcmask 261120   ;;  %vm365_vm2 = vcmask 1043456   ;;  %vm398_vm3 = vcmask 1047556  }
  0x15   : > { %250 = vperm.xlu0 %786, %v232_v0   ;;  %240 = vperm.xlu1 %787, %v230_v2   ;;  %s725_s10 = sshll.u32 %s217_s9, 3  ;;  %v223_v8 = vld [vmem:[%s1209_s1 + $0x10] sm:$0xff]  ;;  %v302_v10 = vld [vmem:[%s1212_s4 + $0x18] sm:$0xff]  ;;  %v299_v13 = vld [vmem:[%s1212_s4] sm:$0xff] }
  0x16   : > { %788 = vset.pattern.permute.xlu2 %v885_v1  ;;  %s219_s13 = scalar_lea.vmem %s1208_s0, %s725_s10  ;;  %v301_v9 = vld [vmem:[%s1212_s4 + $0x10] sm:$0xff]  ;;  %v224_v11 = vld [vmem:[%s1209_s1 + $0x18] sm:$0xff]  ;;  %v300_v17 = vld [vmem:[%s1212_s4 + $0x8] sm:$0xff]  ;;  %s213_s10 = sand.u32 1, %s875_s19  }
  0x17   : > { %v220_v5 = vld [vmem:[%s219_s13] sm:$0xff]  ;;  %305 = vperm.xlu2 %788, %v299_v13   ;;  %v227_v31 = vld [vmem:[%s1211_s3 + $0x10] sm:$0xff]  ;;  %v226_v32 = vld [vmem:[%s1211_s3 + $0x8] sm:$0xff]  ;;  %s724_s11 = sshll.u32 %s213_s10, 5  ;;  %s735_s13 = sshll.u32 %s940_s22, 3 }
  0x18   : > { %738 = vmatpush.msra.mxu3 %v220_v5  ;;  %281 = vmatpush.msra.mxu0 %v220_v5  ;;  %v225_v30 = vld [vmem:[%s1211_s3] sm:$0xff]  ;;  %v228_v33 = vld [vmem:[%s1211_s3 + $0x18] sm:$0xff]  ;;  %s1143_s12 = scalar_lea.vmem [#allocation2], %s724_s11  ;;  %s654_s16 = scalar_lea.hbm %s1213_s5, %s735_s13 }
  0x19   : > { %727 = vmatmul.msk.f32.vlgmr.msra.gmra.mxu3 %vm253_vm0, %v222_v3  ;;  %726 = vmatmul.msk.f32.vlgmr.msra.gmra.mxu0 %vm253_vm0, %v221_v4  ;;  %s655_s22 = sshll.u32 %s1143_s12, 4  ;;  %s657_s17 = sshll.u32 %s654_s16, 4  ;;  %s656_s22 = int_to_ptr.vmem [resolvable:$true] %s655_s22  ;;  %s658_s17 = int_to_ptr.hbm [resolvable:$true] %s657_s17 }
  0x1a   : > { %s644_s23 = scalar_lea.sflag [#allocation3], %s213_s10  ;;  %s835_s25 = sshra.s32 %s658_s17, 4  ;;  %s836_s25 = int_to_ptr.hbm [resolvable:$true] %s835_s25 }
  0x1b   : > { %s837_s26 = scalar_lea.hbm %s836_s25, 32  ;;  %p842_p0 = scmp.lt.s32.totalorder %s836_s25, %s1213_s5 }
  0x1c   : > { %p838_p11 = scmp.ne.s32.totalorder %s836_s25, %s837_s26  ;;  %p843_p1 = scmp.lt.s32.totalorder %s841_s7, %s837_s26 }
  0x1d   : > { %245 = vperm.xlu0 %786, %v231_v6   ;;  %235 = vperm.xlu1 %787, %v229_v7  }
  0x1e   : > { %p839_p12 = pnand %p838_p11, %p957_p5  ;;  %p844_p2 = por %p843_p1, %p842_p0 }
  0x1f   : > { %310 = vperm.xlu2 %788, %v300_v17  }
  0x20   : > { %p840_p13 = pneg %p839_p12 }
  0x21   : > { %728 = vmatmul.msk.f32.gmra.mxu3 %vm253_vm0, %v223_v8 }
  0x22   : > { %p845_p3 = pnand %p844_p2, %p840_p13 }
  0x25   : > { %315 = vperm.xlu0 %786, %v301_v9   ;;  %320 = vperm.xlu1 %787, %v302_v10  }
  0x29   : > { %729 = vmatmul.msk.f32.gmra.mxu3 %vm253_vm0, %v224_v11 }
  0x71   : > { %v306_v34 = vpop.permute.xlu2 %305 }
  0x79   : > { %v311_v48 = vpop.permute.xlu2 %310 }
  0x87   : > { %v251_v14 = vpop.permute.xlu0 %250  ;;  %v241_v16 = vpop.permute.xlu1 %240 }
  0x8f   : > { %v246_v18 = vpop.permute.xlu0 %245  ;;  %v236_v25 = vpop.permute.xlu1 %235 }
  0x96   : > { %v283_v22 = vpop.f32.mrf.mxu0 }
  0x97   : > { %v284_v27 = vadd.f32 %v283_v22, %v236_v25  ;;  %v316_v41 = vpop.permute.xlu0 %315  ;;  %v321_v1 = vpop.permute.xlu1 %320 }
  0x99   : > { %v295_v29 = vmax.f32 %v284_v27, 0.0 }
  0x9c   : > { %v286_v12 = vpop.f32.mrf.mxu3 }
  0x9d   : > { %v287_v23 = vadd.f32 %v286_v12, %v241_v16 }
  0x9f   : > { %v296_v28 = vmax.f32 %v287_v23, 0.0 }
  0xa4   : > { %v289_v15 = vpop.f32.mrf.mxu3 }
  0xa5   : > { %v290_v20 = vadd.f32 %v289_v15, %v246_v18 }
  0xa7   : > { %v297_v26 = vmax.f32 %v290_v20, 0.0 }
  0xac   : > { %v292_v19 = vpop.f32.mrf.mxu3 }
  0xad   : > { %v293_v21 = vadd.f32 %v292_v19, %v251_v14 }
  0xaf   : > { %v298_v24 = vmax.f32 %v293_v21, 0.0 }
  0xb1   : > { %348 = vmatpush.msra.mxu1 %v298_v24  ;;  %739 = vmatpush.msra.mxu2 %v298_v24 }
  0xb3   : > { %349 = vmatpush.msra.mxu1 %v297_v26  ;;  %740 = vmatpush.msra.mxu2 %v297_v26 }
  0xb5   : > { %350 = vmatpush.msra.mxu1 %v296_v28  ;;  %741 = vmatpush.msra.mxu2 %v296_v28 }
  0xb7   : > { %351 = vmatpush.msra.mxu1 %v295_v29  ;;  %742 = vmatpush.msra.mxu2 %v295_v29 }
  0xb8   : > { %730 = vmatmul.msk.f32.vlgmr.msra.gmra.mxu1 %vm323_vm1, %v225_v30  ;;  %732 = vmatmul.msk.f32.vlgmr.msra.gmra.mxu2 %vm323_vm1, %v227_v31 }
  0xc0   : > { %731 = vmatmul.msk.f32.gmra.mxu1 %vm323_vm1, %v226_v32  ;;  %733 = vmatmul.msk.f32.gmra.mxu2 %vm323_vm1, %v228_v33 }
 0x135   : > { %v353_v35 = vpop.f32.mrf.mxu1 }
 0x136   : > { %v354_v36 = vadd.f32 %v353_v35, %v306_v34 }
 0x138   : > { %v366_v37 = vsel %vm365_vm2, %v354_v36, -inf  ;;  %v399_v38 = vsel %vm398_vm3, %v354_v36, -inf }
 0x139   : > { %v367_v39 = vrot.slane %v366_v37, 4  ;;  %v400_v40 = vrot.slane %v399_v38, 4 }
 0x13b   : > { %v368_v42 = vmax.f32 %v366_v37, %v367_v39  ;;  %v401_v43 = vmax.f32 %v399_v38, %v400_v40  ;;  %v359_v44 = vpop.f32.mrf.mxu2 }
 0x13c   : > { %v360_v45 = vadd.f32 %v359_v44, %v316_v41 }
 0x13d   : > { %v369_v46 = vrot.slane %v368_v42, 2  ;;  %v402_v47 = vrot.slane %v401_v43, 2  ;;  %v356_v49 = vpop.f32.mrf.mxu1 }
 0x13e   : > { %v501_v50 = vsel %vm365_vm2, %v360_v45, -inf  ;;  %v533_v51 = vsel %vm398_vm3, %v360_v45, -inf  ;;  %v1028_v52 = vadd.f32 %v356_v49, %v311_v48 }
 0x13f   : > { %v370_v53 = vmax.f32 %v368_v42, %v369_v46  ;;  %v403_v54 = vmax.f32 %v401_v43, %v402_v47  ;;  %v502_v55 = vrot.slane %v501_v50, 4  ;;  %v534_v56 = vrot.slane %v533_v51, 4 }
 0x140   : > { %v434_v57 = vsel %vm365_vm2, %v1028_v52, -inf  ;;  %v466_v58 = vsel %vm398_vm3, %v1028_v52, -inf }
 0x141   : > { %v371_v59 = vrot.slane %v370_v53, 1  ;;  %v404_v60 = vrot.slane %v403_v54, 1  ;;  %v503_v61 = vmax.f32 %v501_v50, %v502_v55  ;;  %v535_v62 = vmax.f32 %v533_v51, %v534_v56 }
 0x142   : > { %v435_v63 = vrot.slane %v434_v57, 4  ;;  %v467_v0 = vrot.slane %v466_v58, 4 }
 0x143   : > { %v372_v2 = vmax.f32 %v370_v53, %v371_v59  ;;  %v405_v3 = vmax.f32 %v403_v54, %v404_v60  ;;  %v504_v4 = vrot.slane %v503_v61, 2  ;;  %v536_v5 = vrot.slane %v535_v62, 2  ;;  %v362_v6 = vpop.f32.mrf.mxu2 }
 0x144   : > { %v436_v7 = vmax.f32 %v434_v57, %v435_v63  ;;  %v468_v8 = vmax.f32 %v466_v58, %v467_v0  ;;  %v1034_v9 = vadd.f32 %v362_v6, %v321_v1 }
 0x145   : > { %v373_v10 = vsub.f32 %v354_v36, %v372_v2  ;;  %v406_v11 = vsub.f32 %v354_v36, %v405_v3  ;;  %v505_v12 = vmax.f32 %v503_v61, %v504_v4  ;;  %v537_v13 = vmax.f32 %v535_v62, %v536_v5 }
 0x146   : > { %v437_v14 = vrot.slane %v436_v7, 2  ;;  %v469_v15 = vrot.slane %v468_v8, 2  ;;  %v568_v16 = vsel %vm365_vm2, %v1034_v9, -inf  ;;  %v600_v17 = vsel %vm398_vm3, %v1034_v9, -inf }
 0x147   : > { %v374_v18 = vmul.f32 1.442695, %v373_v10  ;;  %v407_v19 = vmul.f32 1.442695, %v406_v11  ;;  %v506_v20 = vrot.slane %v505_v12, 1  ;;  %v538_v21 = vrot.slane %v537_v13, 1 }
 0x148   : > { %v438_v22 = vmax.f32 %v436_v7, %v437_v14  ;;  %v470_v23 = vmax.f32 %v468_v8, %v469_v15  ;;  %v569_v24 = vrot.slane %v568_v16, 4  ;;  %v601_v25 = vrot.slane %v600_v17, 4 }
 0x149   : > { %789 = vpow2.f32 %v374_v18  ;;  %v507_v26 = vmax.f32 %v505_v12, %v506_v20  ;;  %v539_v27 = vmax.f32 %v537_v13, %v538_v21 }
 0x14a   : > { %791 = vpow2.f32 %v407_v19  ;;  %v439_v28 = vrot.slane %v438_v22, 1  ;;  %v471_v29 = vrot.slane %v470_v23, 1  ;;  %v570_v30 = vmax.f32 %v568_v16, %v569_v24 }
 0x14b   : > { %v508_v31 = vsub.f32 %v360_v45, %v507_v26  ;;  %v540_v32 = vsub.f32 %v360_v45, %v539_v27  ;;  %v602_v33 = vmax.f32 %v600_v17, %v601_v25 }
 0x14c   : > { %v440_v34 = vmax.f32 %v438_v22, %v439_v28  ;;  %v472_v35 = vmax.f32 %v470_v23, %v471_v29  ;;  %v571_v36 = vrot.slane %v570_v30, 2 }
 0x14d   : > { %v509_v37 = vmul.f32 1.442695, %v508_v31  ;;  %v541_v38 = vmul.f32 1.442695, %v540_v32  ;;  %v603_v39 = vrot.slane %v602_v33, 2 }
 0x14e   : > { %v441_v40 = vsub.f32 %v1028_v52, %v440_v34  ;;  %v473_v41 = vsub.f32 %v1028_v52, %v472_v35  ;;  %v572_v42 = vmax.f32 %v570_v30, %v571_v36 }
 0x14f   : > { %v1042_v43 = vpop.eup %789  ;;  %793 = vpow2.f32 %v509_v37  ;;  %v604_v44 = vmax.f32 %v602_v33, %v603_v39 }
 0x150   : > { %v1044_v46 = vpop.eup %791  ;;  %v376_v45 = vsel %vm365_vm2, %v1042_v43, 0.0  ;;  %795 = vpow2.f32 %v541_v38  ;;  %v442_v47 = vmul.f32 1.442695, %v441_v40  ;;  %v474_v48 = vmul.f32 1.442695, %v473_v41 }
 0x151   : > { %v377_v49 = vrot.slane %v376_v45, 4  ;;  %v410_v50 = vrot.slane %v1044_v46, 4  ;;  %v573_v51 = vrot.slane %v572_v42, 1  ;;  %v605_v53 = vrot.slane %v604_v44, 1 }
 0x152   : > { %797 = vpow2.f32 %v442_v47 }
 0x153   : > { %v378_v52 = vadd.f32 %v377_v49, %v376_v45  ;;  %v412_v54 = vsel %vm365_vm2, %v410_v50, 0.0  ;;  %799 = vpow2.f32 %v474_v48  ;;  %v574_v55 = vmax.f32 %v572_v42, %v573_v51 }
 0x154   : > { %v413_v56 = vrot.slane %v412_v54, 4  ;;  %v606_v63 = vmax.f32 %v604_v44, %v605_v53 }
 0x155   : > { %v1050_v57 = vpop.eup %793  ;;  %v379_v58 = vrot.slane %v378_v52, 2  ;;  %v575_v59 = vsub.f32 %v1034_v9, %v574_v55 }
 0x156   : > { %v1053_v60 = vpop.eup %795  ;;  %v414_v61 = vadd.f32 %v413_v56, %v412_v54  ;;  %v511_v62 = vsel %vm365_vm2, %v1050_v57, 0.0  ;;  %v607_v18 = vsub.f32 %v1034_v9, %v606_v63 }
 0x157   : > { %v380_v0 = vadd.f32 %v379_v58, %v378_v52  ;;  %v512_v1 = vrot.slane %v511_v62, 4  ;;  %v544_v2 = vrot.slane %v1053_v60, 4  ;;  %v576_v3 = vmul.f32 1.442695, %v575_v59 }
 0x158   : > { %v1058_v4 = vpop.eup %797  ;;  %v415_v5 = vrot.slane %v414_v61, 2  ;;  %v608_v28 = vmul.f32 1.442695, %v607_v18 }
 0x159   : > { %v1060_v6 = vpop.eup %799  ;;  %v381_v7 = vrot.slane %v380_v0, 1  ;;  %v513_v8 = vadd.f32 %v512_v1, %v511_v62  ;;  %v546_v10 = vsel %vm365_vm2, %v544_v2, 0.0  ;;  %v444_v11 = vsel %vm365_vm2, %v1058_v4, 0.0 }
 0x15a   : > { %v416_v12 = vadd.f32 %v415_v5, %v414_v61  ;;  %v547_v13 = vrot.slane %v546_v10, 4  ;;  %v445_v14 = vrot.slane %v444_v11, 4  ;;  %v477_v15 = vrot.slane %v1060_v6, 4 }
 0x15b   : > { %v382_v16 = vadd.f32 %v381_v7, %v380_v0  ;;  %v514_v17 = vrot.slane %v513_v8, 2  ;;  %801 = vpow2.f32 %v576_v3 }
 0x15c   : > { %v417_v19 = vrot.slane %v416_v12, 1  ;;  %v548_v20 = vadd.f32 %v547_v13, %v546_v10  ;;  %v446_v21 = vadd.f32 %v445_v14, %v444_v11  ;;  %v479_v22 = vsel %vm365_vm2, %v477_v15, 0.0 }
 0x15d   : > { %803 = vrcp.f32 %v382_v16  ;;  %v515_v24 = vadd.f32 %v514_v17, %v513_v8  ;;  %v480_v27 = vrot.slane %v479_v22, 4  ;;  %v392_v40 = vand.u32 2147483647, %v382_v16 }
 0x15e   : > { %v1068_v23 = vadd.f32 %v417_v19, %v416_v12  ;;  %v549_v25 = vrot.slane %v548_v20, 2  ;;  %v447_v26 = vrot.slane %v446_v21, 2  ;;  %v394_v41 = vand.u32 2147483648, %v382_v16 }
 0x15f   : > { %v516_v30 = vrot.slane %v515_v24, 1  ;;  %v481_v32 = vadd.f32 %v480_v27, %v479_v22  ;;  %vm388_vm4 = vweird.f32 %v382_v16  ;;  %vm1086_vm6 = vcmp.eq.f32.partialorder %v392_v40, 8.507059e+37 }
 0x160   : > { %805 = vrcp.f32 %v1068_v23  ;;  %v550_v31 = vadd.f32 %v549_v25, %v548_v20  ;;  %v448_v9 = vadd.f32 %v447_v26, %v446_v21  ;;  %v428_v45 = vand.u32 2147483647, %v1068_v23 }
 0x161   : > { %v1071_v29 = vpop.eup %801  ;;  %v1073_v34 = vadd.f32 %v516_v30, %v515_v24  ;;  %v482_v37 = vrot.slane %v481_v32, 2  ;;  %807 = vpow2.f32 %v608_v28  ;;  %v430_v52 = vand.u32 2147483648, %v1068_v23 }
 0x162   : > { %v551_v35 = vrot.slane %v550_v31, 1  ;;  %v449_v36 = vrot.slane %v448_v9, 1  ;;  %v578_v39 = vsel %vm365_vm2, %v1071_v29, 0.0  ;;  %v395_v61 = vor.u32 1.1754944e-38, %v394_v41 }
 0x163   : > { %v804_v33 = vpop.eup %803  ;;  %809 = vrcp.f32 %v1073_v34  ;;  %v483_v50 = vadd.f32 %v482_v37, %v481_v32  ;;  %v579_v51 = vrot.slane %v578_v39, 4  ;;  %v527_v56 = vand.u32 2147483647, %v1073_v34 }
 0x164   : > { %v384_v38 = vmul.f32 %v804_v33, %v382_v16  ;;  %v1079_v47 = vadd.f32 %v551_v35, %v550_v31  ;;  %v1081_v48 = vadd.f32 %v449_v36, %v448_v9  ;;  %vm389_vm5 = vweird.f32 %v804_v33 }
 0x165   : > { %vm424_vm7 = vweird.f32 %v1068_v23  ;;  %vm1095_vm8 = vcmp.eq.f32.partialorder %v428_v45, 8.507059e+37  ;;  %vm1101_vm9 = vmor %vm388_vm4, %vm389_vm5  ;;  %v484_v2 = vrot.slane %v483_v50, 1  ;;  %v580_v3 = vadd.f32 %v579_v51, %v578_v39 }
 0x166   : > { %v806_v42 = vpop.eup %805  ;;  %v385_v44 = vsub.f32 1.0, %v384_v38  ;;  %811 = vrcp.f32 %v1079_v47  ;;  %v431_v7 = vor.u32 1.1754944e-38, %v430_v52  ;;  %vm523_vm11 = vweird.f32 %v1073_v34 }
 0x167   : > { %v420_v49 = vmul.f32 %v806_v42, %v1068_v23  ;;  %813 = vrcp.f32 %v1081_v48  ;;  %v1092_v58 = vpop.eup %807  ;;  %vm425_vm10 = vweird.f32 %v806_v42  ;;  %vm1109_vm12 = vcmp.eq.f32.partialorder %v527_v56, 8.507059e+37 }
 0x168   : > { %v386_v53 = vmul.f32 %v804_v33, %v385_v44  ;;  %v529_v12 = vand.u32 2147483648, %v1073_v34  ;;  %v1114_v13 = vadd.f32 %v484_v2, %v483_v50  ;;  %vm426_vm13 = vmor %vm424_vm7, %vm425_vm10  ;;  %v562_v17 = vand.u32 2147483647, %v1079_v47 }
 0x169   : > { %v421_v55 = vsub.f32 1.0, %v420_v49  ;;  %v810_v63 = vpop.eup %809  ;;  %v581_v18 = vrot.slane %v580_v3, 2  ;;  %v611_v22 = vrot.slane %v1092_v58, 4  ;;  %v564_v30 = vand.u32 2147483648, %v1079_v47 }
 0x16a   : > { %v387_v59 = vadd.f32 %v804_v33, %v386_v53  ;;  %v519_v8 = vmul.f32 %v810_v63, %v1073_v34  ;;  %815 = vrcp.f32 %v1114_v13  ;;  %vm524_vm14 = vweird.f32 %v810_v63 }
 0x16b   : > { %v422_v1 = vmul.f32 %v806_v42, %v421_v55  ;;  %v530_v9 = vor.u32 1.1754944e-38, %v529_v12  ;;  %vm1138_vm15 = vmor %vm523_vm11, %vm524_vm14  ;;  %vm558_vm1 = vweird.f32 %v1079_v47  ;;  %vm563_vm3 = vcmp.eq.f32.partialorder %v562_v17, 8.507059e+37 }
 0x16c   : > { %v391_v5 = vsel %vm1101_vm9, %v804_v33, %v387_v59  ;;  %v812_v14 = vpop.eup %811  ;;  %v520_v16 = vsub.f32 1.0, %v519_v8  ;;  %v582_v33 = vadd.f32 %v581_v18, %v580_v3  ;;  %v565_v41 = vor.u32 1.1754944e-38, %v564_v30 }
 0x16d   : > { %v423_v10 = vadd.f32 %v806_v42, %v422_v1  ;;  %v396_v15 = vsel %vm1086_vm6, %v395_v61, %v391_v5  ;;  %v1123_v19 = vpop.eup %813  ;;  %v554_v21 = vmul.f32 %v812_v14, %v1079_v47  ;;  %vm559_vm0 = vweird.f32 %v812_v14 }
 0x16e   : > { %v521_v25 = vmul.f32 %v810_v63, %v520_v16  ;;  %v452_v23 = vmul.f32 %v1123_v19, %v1081_v48  ;;  %v397_v26 = vmul.f32 %v1042_v43, %v396_v15  ;;  %v613_v43 = vsel %vm365_vm2, %v611_v22, 0.0  ;;  %vm560_vm4 = vmor %vm558_vm1, %vm559_vm0 }
 0x16f   : > { %v427_v20 = vsel %vm426_vm13, %v806_v42, %v423_v10  ;;  %v555_v28 = vsub.f32 1.0, %v554_v21  ;;  %v583_v34 = vrot.slane %v582_v33, 1  ;;  %v614_v42 = vrot.slane %v613_v43, 4 }
 0x170   : > { %v432_v24 = vsel %vm1095_vm8, %v431_v7, %v427_v20  ;;  %v522_v31 = vadd.f32 %v810_v63, %v521_v25  ;;  %v453_v32 = vsub.f32 1.0, %v452_v23  ;;  %v816_v39 = vpop.eup %815  ;;  %vm457_vm5 = vweird.f32 %v1123_v19 }
 0x171   : > { %v433_v27 = vmul.f32 %v1044_v46, %v432_v24  ;;  %v556_v37 = vmul.f32 %v812_v14, %v555_v28  ;;  %v487_v49 = vmul.f32 %v816_v39, %v1114_v13  ;;  %v462_v47 = vand.u32 2147483648, %v1081_v48 }
 0x172   : > { %v526_v46 = vsel %vm1138_vm15, %v810_v63, %v522_v31  ;;  %v454_v38 = vmul.f32 %v1123_v19, %v453_v32  ;;  %v584_v51 = vadd.f32 %v583_v34, %v582_v33  ;;  %v615_v53 = vadd.f32 %v614_v42, %v613_v43 }
 0x173   : > { %v635_v35 = vsel %vm365_vm2, %v397_v26, %v433_v27  ;;  %v557_v40 = vadd.f32 %v812_v14, %v556_v37  ;;  %v531_v44 = vsel %vm1109_vm12, %v530_v9, %v526_v46  ;;  %vm456_vm6 = vweird.f32 %v1081_v48 }
 0x174   : > { %639 = vst [vmem:[%s1143_s12] sm:$0xff] %v635_v35  ;;  %v455_v45 = vadd.f32 %v1123_v19, %v454_v38  ;;  %v460_v54 = vand.u32 2147483647, %v1081_v48  ;;  %v488_v55 = vsub.f32 1.0, %v487_v49  ;;  %v532_v56 = vmul.f32 %v1050_v57, %v531_v44  ;;  %vm458_vm7 = vmor %vm456_vm6, %vm457_vm5 }
 0x175   : > { %v561_v50 = vsel %vm560_vm4, %v812_v14, %v557_v40  ;;  %v497_v61 = vand.u32 2147483648, %v1114_v13  ;;  %817 = vrcp.f32 %v584_v51  ;;  %vm492_vm8 = vweird.f32 %v816_v39 }
 0x176   : > { %v566_v52 = vsel %vm563_vm3, %v565_v41, %v561_v50  ;;  %v459_v62 = vsel %vm458_vm7, %v1123_v19, %v455_v45  ;;  %v489_v63 = vmul.f32 %v816_v39, %v488_v55  ;;  %v495_v0 = vand.u32 2147483647, %v1114_v13 }
 0x177   : > { %v567_v59 = vmul.f32 %v1053_v60, %v566_v52  ;;  %v463_v2 = vor.u32 1.1754944e-38, %v462_v47  ;;  %v616_v3 = vrot.slane %v615_v53, 2  ;;  %vm461_vm9 = vcmp.eq.f32.partialorder %v460_v54, 8.507059e+37 }
 0x178   : > { %v490_v48 = vadd.f32 %v816_v39, %v489_v63  ;;  %vm491_vm10 = vweird.f32 %v1114_v13  ;;  %v498_v60 = vor.u32 1.1754944e-38, %v497_v61  ;;  %vm496_vm12 = vcmp.eq.f32.partialorder %v495_v0, 8.507059e+37 }
 0x179   : > { %v637_v1 = vsel %vm365_vm2, %v532_v56, %v567_v59  ;;  %v464_v57 = vsel %vm461_vm9, %v463_v2, %v459_v62  ;;  %vm493_vm11 = vmor %vm491_vm10, %vm492_vm8  ;;  %v617_v5 = vadd.f32 %v616_v3, %v615_v53  ;;  %v596_v22 = vand.u32 2147483648, %v584_v51 }
 0x17a   : > { %641 = vst [vmem:[%s1143_s12 + $0x10] sm:$0xff] %v637_v1  ;;  %v494_v7 = vsel %vm493_vm11, %v816_v39, %v490_v48  ;;  %v465_v12 = vmul.f32 %v1058_v4, %v464_v57  ;;  %vm590_vm14 = vweird.f32 %v584_v51  ;;  %v594_v24 = vand.u32 2147483647, %v584_v51 }
 0x17b   : > { %v818_v8 = vpop.eup %817  ;;  %v499_v10 = vsel %vm496_vm12, %v498_v60, %v494_v7  ;;  %v618_v11 = vrot.slane %v617_v5, 1  ;;  %v597_v27 = vor.u32 1.1754944e-38, %v596_v22 }
 0x17c   : > { %v500_v14 = vmul.f32 %v1060_v6, %v499_v10  ;;  %v586_v15 = vmul.f32 %v818_v8, %v584_v51  ;;  %vm591_vm13 = vweird.f32 %v818_v8  ;;  %vm595_vm1 = vcmp.eq.f32.partialorder %v594_v24, 8.507059e+37 }
 0x17d   : > { %v619_v16 = vadd.f32 %v618_v11, %v617_v5  ;;  %vm592_vm15 = vmor %vm590_vm14, %vm591_vm13 }
 0x17e   : > { %v636_v17 = vsel %vm365_vm2, %v465_v12, %v500_v14  ;;  %v587_v13 = vsub.f32 1.0, %v586_v15 }
 0x17f   : > { %640 = vst [vmem:[%s1143_s12 + $0x8] sm:$0xff] %v636_v17  ;;  %819 = vrcp.f32 %v619_v16  ;;  %v631_v6 = vand.u32 2147483648, %v619_v16  ;;  %v629_v26 = vand.u32 2147483647, %v619_v16  ;;  %vm625_vm3 = vweird.f32 %v619_v16 }
 0x180   : > { %v588_v18 = vmul.f32 %v818_v8, %v587_v13 }
 0x181   : > { %v632_v31 = vor.u32 1.1754944e-38, %v631_v6  ;;  %vm630_vm5 = vcmp.eq.f32.partialorder %v629_v26, 8.507059e+37 }
 0x182   : > { %v589_v20 = vadd.f32 %v818_v8, %v588_v18 }
 0x184   : > { %v593_v25 = vsel %vm592_vm15, %v818_v8, %v589_v20 }
 0x185   : > { %v820_v19 = vpop.eup %819  ;;  %v598_v30 = vsel %vm595_vm1, %v597_v27, %v593_v25 }
 0x186   : > { %v621_v21 = vmul.f32 %v820_v19, %v619_v16  ;;  %vm626_vm0 = vweird.f32 %v820_v19  ;;  %v599_v33 = vmul.f32 %v1071_v29, %v598_v30 }
 0x187   : > { %vm627_vm4 = vmor %vm625_vm3, %vm626_vm0 }
 0x188   : > { %v622_v4 = vsub.f32 1.0, %v621_v21 }
 0x18a   : > { %v623_v23 = vmul.f32 %v820_v19, %v622_v4 }
 0x18c   : > { %v624_v28 = vadd.f32 %v820_v19, %v623_v23 }
 0x18e   : > { %v628_v9 = vsel %vm627_vm4, %v820_v19, %v624_v28 }
 0x18f   : > { %v633_v32 = vsel %vm630_vm5, %v632_v31, %v628_v9 }
 0x190   : > { %v634_v35 = vmul.f32 %v1092_v58, %v633_v32 }
 0x192   : > { %v638_v36 = vsel %vm365_vm2, %v599_v33, %v634_v35 }
 0x193   : > { %642 = vst [vmem:[%s1143_s12 + $0x18] sm:$0xff] %v638_v36 }
 0x194   : > { %848 = shalt.err (!%p845_p3)
}
 0x195   : > { %s886_s10 = smov 128   ;;  %s887_s11 = smov 256  }
 0x196   : > { %s888_s12 = smov 8  }
 0x197   : > { %743 = dma.vmem_to_hbm [thread:$0]  (%p957_p5), %s656_s22, 512, %s658_s17, %s644_s23, %s886_s10, %s887_s11, %s888_s12  }
 0x198 PF: > { %p749_p4 = scmp.ge.s32.totalorder %s883_s21, 2  ;;  %s672_s13 = sand.u32 1, %s871_s18  }
 0x199   : > { %s673_s14 = scalar_lea.sflag [#allocation3], %s672_s13 }
 0x19a   : > { %p746_p7 = pnand %p749_p4, %p961_p6 }
 0x19c   : > { %p747_p8 = pneg %p746_p7 }
 0x19e   : > { %866 = dma.done.wait (%p747_p8), %s673_s14, 512  }
 0x19f   : > { %868 = vsyncadd (%p747_p8), %s673_s14, 4294966784  ;;  %p15_p9 = scmp.ge.s32.totalorder %s944_s24, 4   ;;  %s1226_s18 = smov %s875_s19 }
 0x1a0   : > { %s1227_s19 = smov %s879_s20  ;;  %s1228_s20 = smov %s955_s27 }
 0x1a1   : > { %s1229_s21 = smov %s944_s24  ;;  %17 = sbr.rel (!%p15_p9) target bundleno = 3 (0x3), region = 75 }
 0x1a6   :  { %679 = vsyncpa [#allocation3], 1 }
 0x1a7   :  { %681 = vsyncpa [#allocation3 + $0x1], 1 }

</bundles_post_ra>
